<compile_context>
chip_gen: v7x
topology: tpu7x:2x2x1
jax: 0.10.0
libtpu: 0.0.40
codegen_flags: <defaults>
</compile_context>

<pallas_src>
import functools
import math

import jax
import jax.numpy as jnp
from jax.experimental import pallas as pl
from jax.experimental.pallas import tpu as pltpu


# ----------------------------------------------------------------------------
# Kernels
# ----------------------------------------------------------------------------
def _posenc_kernel_3d(x_ref, pe_ref, o_ref):
    # x_ref: (tl, B, D)   pe_ref: (tl, D)   o_ref: (tl, B, D)
    # (B, D) are the trailing (sublane, lane) dims -- used when they are dense.
    o_ref[...] = (x_ref[...] + pe_ref[...][:, None, :]).astype(o_ref.dtype)


def _posenc_kernel_flat(x_ref, pe_ref, o_ref, *, batch):
    # x_ref: (tl, B*D)   pe_ref: (tl, D)   o_ref: (tl, B*D)
    # Flattened layout for small B / non-128-multiple D: the widest axis sits
    # on lanes.  pe is replicated across batch along the lane axis.
    pe = pe_ref[...]
    if batch > 1:
        pe = jnp.concatenate([pe] * batch, axis=-1)  # (tl, B*D), batch-major
    o_ref[...] = (x_ref[...] + pe).astype(o_ref.dtype)


# ----------------------------------------------------------------------------
# Tile selection (byte-budgeted, VMEM-aware)
# ----------------------------------------------------------------------------
_TARGET_BLOCK_BYTES = 8 * 1024 * 1024   # ~8 MiB x blocks -> near HBM roofline
_VMEM_WS_BUDGET = 24 * 1024 * 1024      # dbl-buffered working set (v7x: 64 MiB VMEM)
_VMEM_LIMIT_BYTES = 48 * 1024 * 1024    # raise scoped VMEM (v5e default 16 MiB)


def _choose_seq_tile(seq_len: int, x_row_bytes: int, pe_row_bytes: int) -> int:
    """Pick a seq tile: ~8 MiB x blocks, <=24 MiB working set, multiple of 8."""
    tl = max(_TARGET_BLOCK_BYTES // max(x_row_bytes, 1), 1)
    # working set ~= 2 bufs * (x block + out block) + 2 * pe block
    ws_per_row = 4 * x_row_bytes + 2 * pe_row_bytes
    tl = min(tl, max(_VMEM_WS_BUDGET // max(ws_per_row, 1), 1))
    if seq_len > 8:
        # ensure >= 2 grid steps so v7x's two TensorCores both get work
        tl = min(tl, -(-seq_len // 2))
    tl = min(tl, seq_len)
    # pe block is (tl, D): tl must be sublane-aligned (multiple of 8)
    return max(8, (tl // 8) * 8)


# ----------------------------------------------------------------------------
# Forward wrapper
# ----------------------------------------------------------------------------
def positional_encoding_forward(x, pe):
    """x: (L, B, D), pe: (max_len, D)  ->  x + pe[:L] broadcast over batch."""
    L, B, D = x.shape
    max_len, d_pe = pe.shape
    if d_pe != D:
        raise ValueError(f"d_model mismatch: x has {D}, pe has {d_pe}")
    if L > max_len:
        raise ValueError(f"sequence length {L} exceeds max_len {max_len}")
    if pe.dtype != x.dtype:
        # Ideally pe is built in the activation dtype once at init; this cast
        # only fires if the caller did not.
        pe = pe.astype(x.dtype)

    itemsize = jnp.dtype(x.dtype).itemsize
    tl = _choose_seq_tile(L, B * D * itemsize, D * itemsize)
    grid = (pl.cdiv(L, tl),)

    cost = pl.CostEstimate(
        flops=L * B * D,                                   # one add per output
        transcendentals=0,
        bytes_accessed=(2 * L * B * D + L * D) * itemsize,
    )
    compiler_params = pltpu.CompilerParams(
        dimension_semantics=("parallel",),
        vmem_limit_bytes=_VMEM_LIMIT_BYTES,
    )

    if (D % 128 == 0) and (B >= 8):
        # Production-like shapes: (B, D) trailing dims already map densely onto
        # (sublane, lane); keep the 3D block layout.
        return pl.pallas_call(
            _posenc_kernel_3d,
            out_shape=jax.ShapeDtypeStruct((L, B, D), x.dtype),
            grid=grid,
            in_specs=[
                pl.BlockSpec((tl, B, D), lambda i: (i, 0, 0)),
                pl.BlockSpec((tl, D), lambda i: (i, 0)),
            ],
            out_specs=pl.BlockSpec((tl, B, D), lambda i: (i, 0, 0)),
            compiler_params=compiler_params,
            cost_estimate=cost,
        )(x, pe)

    # Small batch / non-128-multiple d_model: flatten trailing dims (free
    # row-major reshape) so vregs are denser and stores are less masked.
    x_flat = x.reshape(L, B * D)
    out_flat = pl.pallas_call(
        functools.partial(_posenc_kernel_flat, batch=B),
        out_shape=jax.ShapeDtypeStruct((L, B * D), x.dtype),
        grid=grid,
        in_specs=[
            pl.BlockSpec((tl, B * D), lambda i: (i, 0)),
            pl.BlockSpec((tl, D), lambda i: (i, 0)),
        ],
        out_specs=pl.BlockSpec((tl, B * D), lambda i: (i, 0)),
        compiler_params=compiler_params,
        cost_estimate=cost,
    )(x_flat, pe)
    return out_flat.reshape(L, B, D)


# ----------------------------------------------------------------------------
# PE buffer construction (matches the PyTorch register_buffer computation)
# ----------------------------------------------------------------------------
def make_positional_encoding(max_len: int, d_model: int,
                             dtype=jnp.float32) -> jnp.ndarray:
    position = jnp.arange(max_len, dtype=jnp.float32)[:, None]          # (L, 1)
    div_term = jnp.exp(
        jnp.arange(0, d_model, 2, dtype=jnp.float32)
        * (-math.log(10000.0) / d_model)
    )
    pe = jnp.zeros((max_len, d_model), jnp.float32)
    pe = pe.at[:, 0::2].set(jnp.sin(position * div_term))
    # robust to odd d_model: the cos slice has only d_model // 2 columns
    pe = pe.at[:, 1::2].set(jnp.cos(position * div_term[: d_model // 2]))
    return pe.astype(dtype)                                              # (max_len, D)


# ----------------------------------------------------------------------------
if __name__ == "__main__":
    D_MODEL = 32
    MAX_LEN = 5000
    SEQ_LEN = 8
    BATCH = 2

    key = jax.random.PRNGKey(0)

    # --- Small demo shape (module defaults): exercises the flattened path. ---
    pe = make_positional_encoding(MAX_LEN, D_MODEL)
    x = jax.random.normal(key, (SEQ_LEN, BATCH, D_MODEL), dtype=jnp.float32)

    out = jax.block_until_ready(positional_encoding_forward(x, pe))
    ref = x + pe[:SEQ_LEN][:, None, :]           # dropout == identity (eval)
    assert out.shape == (SEQ_LEN, BATCH, D_MODEL), out.shape
    assert bool(jnp.all(jnp.isfinite(out)))
    assert bool(jnp.allclose(out, ref, atol=1e-6, rtol=1e-6))

    # --- Production-like trailing dims: exercises the (tl, B, D) path and a
    #     multi-step cdiv grid with a ragged last block. ---
    pe2 = make_positional_encoding(MAX_LEN, 128)
    x2 = jax.random.normal(jax.random.PRNGKey(1), (20, 8, 128), dtype=jnp.float32)
    out2 = jax.block_until_ready(positional_encoding_forward(x2, pe2))
    ref2 = x2 + pe2[:20][:, None, :]
    assert bool(jnp.allclose(out2, ref2, atol=1e-6, rtol=1e-6))

    print("KERNEL_OK")
</pallas_src>

<mosaic_0001>
module attributes {stable_mosaic.version = 11 : i64} {
  func.func @_posenc_kernel_flat(%arg0: i32, %arg1: memref<8x64xf32, #tpu.memory_space<vmem>>, %arg2: memref<8x32xf32, #tpu.memory_space<vmem>>, %arg3: memref<8x64xf32, #tpu.memory_space<vmem>>) attributes {dimension_semantics = [#tpu.dimension_semantics<parallel>], iteration_bounds = array<i64: 1>, scalar_prefetch = 0 : i64, scratch_operands = 0 : i64, tpu.core_type = #tpu.core_type<tc>, window_params = [{transform_indices = @transform_0, window_bounds = array<i64: 8, 64>}, {transform_indices = @transform_1, window_bounds = array<i64: 8, 32>}, {transform_indices = @transform_2, window_bounds = array<i64: 8, 64>}]} {
    %c0 = arith.constant 0 : index
    %c0_0 = arith.constant 0 : index
    %0 = vector.load %arg2[%c0, %c0_0] : memref<8x32xf32, #tpu.memory_space<vmem>>, vector<8x32xf32>
    %1 = tpu.concatenate %0, %0 in 1 : vector<8x32xf32>, vector<8x32xf32> -> vector<8x64xf32>
    %c0_1 = arith.constant 0 : index
    %c0_2 = arith.constant 0 : index
    %2 = vector.load %arg1[%c0_1, %c0_2] : memref<8x64xf32, #tpu.memory_space<vmem>>, vector<8x64xf32>
    %3 = arith.addf %2, %1 : vector<8x64xf32>
    %c0_3 = arith.constant 0 : index
    %c0_4 = arith.constant 0 : index
    %4 = vector.load %arg3[%c0_3, %c0_4] : memref<8x64xf32, #tpu.memory_space<vmem>>, vector<8x64xf32>
    tpu.vector_store %arg3[%c0_3, %c0_4], %3 {strides = array<i32>} : memref<8x64xf32, #tpu.memory_space<vmem>>, vector<8x64xf32>,
    return
  }
  func.func @transform_0(%arg0: i32) -> (i32, i32) {
    %c0_i32 = arith.constant 0 : i32
    %c0_i32_0 = arith.constant 0 : i32
    return %arg0, %c0_i32 : i32, i32
  }
  func.func @transform_1(%arg0: i32) -> (i32, i32) {
    %c0_i32 = arith.constant 0 : i32
    %c0_i32_0 = arith.constant 0 : i32
    return %arg0, %c0_i32 : i32, i32
  }
  func.func @transform_2(%arg0: i32) -> (i32, i32) {
    %c0_i32 = arith.constant 0 : i32
    %c0_i32_0 = arith.constant 0 : i32
    return %arg0, %c0_i32 : i32, i32
  }
}

</mosaic_0001>

<bundles_post_ra>
// kernel: tpu_custom_call.1
= control target key start
LH: loop header
LB: loop body
LE: loop exit
PB: predicated region body
PF: predicated region fallthrough
CT: control target
= control target key end

     0   :  { %s98_s0 = inlined_call_operand.vmem [shape: f32[8,64], index: 0, kind: input, shape index: {}]   ;;  %s99_s1 = inlined_call_operand.vmem [shape: f32[5000,32], index: 1, kind: input, shape index: {}]   ;;  %s100_s2 = inlined_call_operand.hbm [shape: f32[8,64], index: 2, kind: output, shape index: {}]  }
   0x1   :  { %v12_v0 = vld [vmem:[%s99_s1] sm:$0xff] }
   0x2   :  { %7 = vsyncpa [#allocation3], 0  ;;  %s63_s11 = smov 32   ;;  %vm17_vm0 = vcmask 261120   ;;  %v19_v1 = vld [vmem:[%s98_s0] sm:$0xff]  ;;  %s64_s14 = smov [#allocation2]  }
   0x3   :  { %14 = vrot.lane.b32.xlu0 %v12_v0, %s63_s11  ;;  %s29_s15 = sshll.u32 %s64_s14, 4  ;;  %vm21_vm1 = vcmask 523264   ;;  %s30_s15 = int_to_ptr.vmem [resolvable:$true] %s29_s15 }
   0x4   :  { %s39_s16 = scalar_lea.vmem %s30_s15, 128  ;;  %p44_p1 = scmp.lt.s32.totalorder %s30_s15, %s30_s15 }
   0x5   :  { %p40_p0 = scmp.ne.s32.totalorder %s30_s15, %s39_s16  ;;  %p45_p2 = scmp.lt.s32.totalorder %s39_s16, %s39_s16 }
   0x7   :  { %p46_p3 = por %p45_p2, %p44_p1 }
   0x9   :  { %p47_p4 = pnand %p46_p3, %p40_p0 }
  0x75   :  { %v15_v2 = vpop.permute.xlu0 %14 }
  0x76   :  { %v18_v3 = vsel %vm17_vm0, %v12_v0, %v15_v2 }
  0x77   :  { %v20_v4 = vadd.f32 %v19_v1, %v18_v3 }
  0x79   :  { %22 = vst.msk [vmem:[#allocation2] sm:$0xff] %vm21_vm1, %v20_v4 }
  0x7a   :  { %50 = shalt.err (!%p47_p4)
}
  0x7b   :  { %s51_s18 = scalar_lea.hbm %s100_s2, 128 }
  0x7c   :  { %p52_p5 = scmp.ne.s32.totalorder %s100_s2, %s51_s18  ;;  %p55_p6 = scmp.lt.u32.totalorder %s51_s18, %s100_s2 }
  0x7e   :  { %p57_p7 = pnand %p55_p6, %p52_p5 }
  0x80   :  { %60 = shalt.err (!%p57_p7)
}
  0x81   :  { %32 = dma.vmem_to_hbm [thread:$0]  %s30_s15, 128, %s100_s2, [#allocation3]  }
  0x82   :  { %61 = dma.done.wait [#allocation3], 128  }
  0x83   :  { %62 = vsyncadd [#allocation3], 4294967168 }
  0x84   :  { %36 = vsyncpa [#allocation3], 1 }

</bundles_post_ra>
